<compile_context>
chip_gen: v6e
topology: v6e:2x2x1
jax: 0.10.0
libtpu: 0.0.40
codegen_flags: <defaults>
</compile_context>

<pallas_src>
import functools

import jax
import jax.numpy as jnp
from jax import lax
from jax.experimental import pallas as pl
from jax.experimental.pallas import tpu as pltpu


def _conv_bn_act_kernel(x_ref, w_ref, mask_ref, out_ref, patch_ref,
                        *, W, K, pad, Cin_pad):
    # x_ref:     (Cin_pad, S_tot)        S_tot = N*H*W on the lane axis.
    #                                    Row `Cin` of the padded channels is all
    #                                    ones (bias row); remaining pad rows 0.
    # w_ref:     (Cout, K*K*Cin_pad)     conv weight with BN scale folded in;
    #                                    bias sits in the center tap's ones col.
    # mask_ref:  (K*K, S_tot)            precomputed 0/1 border masks.
    # out_ref:   (Cout, S_tot)
    # patch_ref: VMEM scratch (K*K*Cin_pad, S_tot) - staged im2col patches.
    S_tot = x_ref.shape[1]
    x = x_ref[...]                                    # (Cin_pad, S_tot)

    t = 0
    for kh in range(K):
        dh = kh - pad
        for kw in range(K):
            dw = kw - pad
            d = dh * W + dw
            if d == 0:
                tap = x                               # center tap: mask is all-ones
            else:
                # tap[s] = x[s + d]; wrapped (incl. cross-batch) positions are
                # exactly the spatially-invalid ones and are zeroed by the mask.
                tap = pltpu.roll(x, (-d) % S_tot, 1) * mask_ref[pl.ds(t, 1), :]
            # Static, 8-sublane-aligned, full-lane-width store (no masked vst).
            patch_ref[pl.ds(t * Cin_pad, Cin_pad), :] = tap
            t += 1

    # One MXU contraction does conv + BN scale + BN bias (via the ones row).
    acc = jnp.dot(w_ref[...], patch_ref[...], preferred_element_type=jnp.float32)
    out_ref[...] = jnp.maximum(acc, 0.0).astype(out_ref.dtype)


def conv_bn_act_forward(x_nchw, w, bn_scale, bn_bias, *, stride=1):
    """x_nchw: (N, Cin, H, W) f32. w: (Cout, Cin, K, K). Returns (N, Cout, H, W)."""
    if stride != 1:
        # TODO(synk): stride > 1 (strided output subsampling) not implemented.
        raise NotImplementedError("stride != 1 not implemented")
    N, Cin, H, W = x_nchw.shape
    Cout, _, K, _ = w.shape
    assert K % 2 == 1, "only odd kernel_size (same padding) supported"
    pad = K // 2
    S = H * W
    S_tot = N * S
    KK = K * K
    # Pad channels to a multiple of 8 with room for one "ones" (bias) row.
    Cin_pad = ((Cin + 1 + 7) // 8) * 8
    ones_row = Cin
    t_center = pad * K + pad

    # --- Weights: fold BN scale, lay out as (Cout, KK*Cin_pad) for a single dot.
    w_folded = w * bn_scale[:, None, None, None]                  # (Cout, Cin, K, K)
    w_taps = jnp.transpose(w_folded, (2, 3, 1, 0)).reshape(KK, Cin, Cout)
    w_big = jnp.zeros((KK, Cin_pad, Cout), jnp.float32)
    w_big = w_big.at[:, :Cin, :].set(w_taps)
    w_big = w_big.at[t_center, ones_row, :].set(bn_bias)          # bias via ones row
    w_big = jnp.transpose(w_big.reshape(KK * Cin_pad, Cout), (1, 0))  # (Cout, KK*Cin_pad)

    # --- Input: fold batch onto the lane axis -> (Cin_pad, N*S); add ones row.
    # (Tiny layout plumbing in the wrapper so the kernel is one lane-dense step.)
    x_cm = jnp.transpose(x_nchw.reshape(N, Cin, S), (1, 0, 2)).reshape(Cin, S_tot)
    x_lane = jnp.concatenate(
        [x_cm.astype(jnp.float32),
         jnp.ones((1, S_tot), jnp.float32),
         jnp.zeros((Cin_pad - Cin - 1, S_tot), jnp.float32)], axis=0)

    # --- Border masks: shape-only constant, computed once, tiled over batch.
    h_idx = jnp.arange(S, dtype=jnp.int32) // W
    w_idx = jnp.arange(S, dtype=jnp.int32) % W
    rows = []
    for kh in range(K):
        dh = kh - pad
        for kw in range(K):
            dw = kw - pad
            rows.append((h_idx + dh >= 0) & (h_idx + dh < H) &
                        (w_idx + dw >= 0) & (w_idx + dw < W))
    mask = jnp.tile(jnp.stack(rows).astype(jnp.float32), (1, N))   # (KK, S_tot)

    kernel = functools.partial(_conv_bn_act_kernel, W=W, K=K, pad=pad,
                               Cin_pad=Cin_pad)
    out_lane = pl.pallas_call(
        kernel,
        out_shape=jax.ShapeDtypeStruct((Cout, S_tot), jnp.float32),
        grid_spec=pltpu.PrefetchScalarGridSpec(
            num_scalar_prefetch=0,
            grid=(1,),                                            # single step
            in_specs=[
                pl.BlockSpec((Cin_pad, S_tot), lambda i: (0, 0)),
                pl.BlockSpec((Cout, KK * Cin_pad), lambda i: (0, 0)),
                pl.BlockSpec((KK, S_tot), lambda i: (0, 0)),
            ],
            out_specs=pl.BlockSpec((Cout, S_tot), lambda i: (0, 0)),
            scratch_shapes=[pltpu.VMEM((KK * Cin_pad, S_tot), jnp.float32)],
        ),
        compiler_params=pltpu.CompilerParams(
            dimension_semantics=("arbitrary",)),
    )(x_lane, w_big, mask)

    # (Cout, N*S) -> (N, Cout, H, W)
    out = jnp.transpose(out_lane.reshape(Cout, N, H, W), (1, 0, 2, 3))
    return out.astype(x_nchw.dtype)


def make_params(key, in_chs, out_chs, kernel_size, eps=1e-5):
    """Deterministic synthetic conv weight + folded (inference) BatchNorm params."""
    ks = jax.random.split(key, 5)
    w = 0.2 * jax.random.normal(
        ks[0], (out_chs, in_chs, kernel_size, kernel_size), jnp.float32)
    gamma = 1.0 + 0.1 * jax.random.normal(ks[1], (out_chs,), jnp.float32)
    beta = 0.1 * jax.random.normal(ks[2], (out_chs,), jnp.float32)
    mean = 0.1 * jax.random.normal(ks[3], (out_chs,), jnp.float32)
    var = jnp.abs(1.0 + 0.1 * jax.random.normal(ks[4], (out_chs,), jnp.float32))
    scale = gamma / jnp.sqrt(var + eps)          # BN folded: y = conv(x)*scale + bias
    bias = beta - mean * scale
    return w, scale, bias


def conv_bn_act_reference(x_nchw, w, bn_scale, bn_bias, *, stride=1):
    """Pure-JAX reference of the same forward pass (for validation)."""
    K = w.shape[2]
    pad = K // 2
    y = lax.conv_general_dilated(
        x_nchw, w, window_strides=(stride, stride),
        padding=((pad, pad), (pad, pad)),
        dimension_numbers=('NCHW', 'OIHW', 'NCHW'))
    y = y * bn_scale[None, :, None, None] + bn_bias[None, :, None, None]
    return jnp.maximum(y, 0.0)


if __name__ == "__main__":
    # Small shapes consistent with the module: batch=2, in_chs=4, out_chs=8,
    # spatial=16x16, kernel_size=3, stride=1.
    N, IN_CHS, OUT_CHS, Hs, Ws, KSIZE = 2, 4, 8, 16, 16, 3

    key = jax.random.PRNGKey(0)
    kx, kp = jax.random.split(key)
    x = jax.random.normal(kx, (N, IN_CHS, Hs, Ws), jnp.float32)
    w, scale, bias = make_params(kp, IN_CHS, OUT_CHS, KSIZE)

    out = jax.block_until_ready(conv_bn_act_forward(x, w, scale, bias))
    ref = jax.block_until_ready(conv_bn_act_reference(x, w, scale, bias))

    assert out.shape == (N, OUT_CHS, Hs, Ws), out.shape
    assert jnp.allclose(out, ref, atol=1e-4, rtol=1e-4), \
        float(jnp.max(jnp.abs(out - ref)))

    print("KERNEL_OK")
</pallas_src>

<mosaic_0001>
module attributes {stable_mosaic.version = 11 : i64} {
  func.func @_conv_bn_act_kernel(%arg0: i32, %arg1: memref<8x512xf32, #tpu.memory_space<vmem>>, %arg2: memref<8x72xf32, #tpu.memory_space<vmem>>, %arg3: memref<9x512xf32, #tpu.memory_space<vmem>>, %arg4: memref<8x512xf32, #tpu.memory_space<vmem>>, %arg5: memref<72x512xf32, #tpu.memory_space<vmem>>) attributes {dimension_semantics = [#tpu.dimension_semantics<arbitrary>], iteration_bounds = array<i64: 1>, scalar_prefetch = 0 : i64, scratch_operands = 1 : i64, tpu.core_type = #tpu.core_type<tc>, window_params = [{pipeline_mode = #tpu.pipeline_mode<synchronous>, transform_indices = @transform_0, window_bounds = array<i64: 8, 512>}, {pipeline_mode = #tpu.pipeline_mode<synchronous>, transform_indices = @transform_1, window_bounds = array<i64: 8, 72>}, {pipeline_mode = #tpu.pipeline_mode<synchronous>, transform_indices = @transform_2, window_bounds = array<i64: 9, 512>}, {pipeline_mode = #tpu.pipeline_mode<synchronous>, transform_indices = @transform_3, window_bounds = array<i64: 8, 512>}]} {
    %c0 = arith.constant 0 : index
    %c0_0 = arith.constant 0 : index
    %0 = vector.load %arg1[%c0, %c0_0] : memref<8x512xf32, #tpu.memory_space<vmem>>, vector<8x512xf32>
    %c17_i32 = arith.constant 17 : i32
    %1 = tpu.dynamic_rotate %0 by %c17_i32 dim 1 : vector<8x512xf32>, i32 -> vector<8x512xf32>
    %c0_1 = arith.constant 0 : index
    %c0_2 = arith.constant 0 : index
    %2 = vector.load %arg3[%c0_1, %c0_2] : memref<9x512xf32, #tpu.memory_space<vmem>>, vector<1x512xf32>
    %3 = vector.broadcast %2 : vector<1x512xf32> to vector<8x512xf32>
    %4 = arith.mulf %1, %3 : vector<8x512xf32>
    %c0_3 = arith.constant 0 : index
    %c0_4 = arith.constant 0 : index
    %5 = vector.load %arg5[%c0_3, %c0_4] : memref<72x512xf32, #tpu.memory_space<vmem>>, vector<8x512xf32>
    tpu.vector_store %arg5[%c0_3, %c0_4], %4 {strides = array<i32>} : memref<72x512xf32, #tpu.memory_space<vmem>>, vector<8x512xf32>,
    %c16_i32 = arith.constant 16 : i32
    %6 = tpu.dynamic_rotate %0 by %c16_i32 dim 1 : vector<8x512xf32>, i32 -> vector<8x512xf32>
    %c1 = arith.constant 1 : index
    %c0_5 = arith.constant 0 : index
    %7 = vector.load %arg3[%c1, %c0_5] : memref<9x512xf32, #tpu.memory_space<vmem>>, vector<1x512xf32>
    %8 = vector.broadcast %7 : vector<1x512xf32> to vector<8x512xf32>
    %9 = arith.mulf %6, %8 : vector<8x512xf32>
    %c8 = arith.constant 8 : index
    %c0_6 = arith.constant 0 : index
    %10 = vector.load %arg5[%c8, %c0_6] : memref<72x512xf32, #tpu.memory_space<vmem>>, vector<8x512xf32>
    tpu.vector_store %arg5[%c8, %c0_6], %9 {strides = array<i32>} : memref<72x512xf32, #tpu.memory_space<vmem>>, vector<8x512xf32>,
    %c15_i32 = arith.constant 15 : i32
    %11 = tpu.dynamic_rotate %0 by %c15_i32 dim 1 : vector<8x512xf32>, i32 -> vector<8x512xf32>
    %c2 = arith.constant 2 : index
    %c0_7 = arith.constant 0 : index
    %12 = vector.load %arg3[%c2, %c0_7] : memref<9x512xf32, #tpu.memory_space<vmem>>, vector<1x512xf32>
    %13 = vector.broadcast %12 : vector<1x512xf32> to vector<8x512xf32>
    %14 = arith.mulf %11, %13 : vector<8x512xf32>
    %c16 = arith.constant 16 : index
    %c0_8 = arith.constant 0 : index
    %15 = vector.load %arg5[%c16, %c0_8] : memref<72x512xf32, #tpu.memory_space<vmem>>, vector<8x512xf32>
    tpu.vector_store %arg5[%c16, %c0_8], %14 {strides = array<i32>} : memref<72x512xf32, #tpu.memory_space<vmem>>, vector<8x512xf32>,
    %c1_i32 = arith.constant 1 : i32
    %16 = tpu.dynamic_rotate %0 by %c1_i32 dim 1 : vector<8x512xf32>, i32 -> vector<8x512xf32>
    %c3 = arith.constant 3 : index
    %c0_9 = arith.constant 0 : index
    %17 = vector.load %arg3[%c3, %c0_9] : memref<9x512xf32, #tpu.memory_space<vmem>>, vector<1x512xf32>
    %18 = vector.broadcast %17 : vector<1x512xf32> to vector<8x512xf32>
    %19 = arith.mulf %16, %18 : vector<8x512xf32>
    %c24 = arith.constant 24 : index
    %c0_10 = arith.constant 0 : index
    %20 = vector.load %arg5[%c24, %c0_10] : memref<72x512xf32, #tpu.memory_space<vmem>>, vector<8x512xf32>
    tpu.vector_store %arg5[%c24, %c0_10], %19 {strides = array<i32>} : memref<72x512xf32, #tpu.memory_space<vmem>>, vector<8x512xf32>,
    %c32 = arith.constant 32 : index
    %c0_11 = arith.constant 0 : index
    %21 = vector.load %arg5[%c32, %c0_11] : memref<72x512xf32, #tpu.memory_space<vmem>>, vector<8x512xf32>
    tpu.vector_store %arg5[%c32, %c0_11], %0 {strides = array<i32>} : memref<72x512xf32, #tpu.memory_space<vmem>>, vector<8x512xf32>,
    %c511_i32 = arith.constant 511 : i32
    %22 = tpu.dynamic_rotate %0 by %c511_i32 dim 1 : vector<8x512xf32>, i32 -> vector<8x512xf32>
    %c5 = arith.constant 5 : index
    %c0_12 = arith.constant 0 : index
    %23 = vector.load %arg3[%c5, %c0_12] : memref<9x512xf32, #tpu.memory_space<vmem>>, vector<1x512xf32>
    %24 = vector.broadcast %23 : vector<1x512xf32> to vector<8x512xf32>
    %25 = arith.mulf %22, %24 : vector<8x512xf32>
    %c40 = arith.constant 40 : index
    %c0_13 = arith.constant 0 : index
    %26 = vector.load %arg5[%c40, %c0_13] : memref<72x512xf32, #tpu.memory_space<vmem>>, vector<8x512xf32>
    tpu.vector_store %arg5[%c40, %c0_13], %25 {strides = array<i32>} : memref<72x512xf32, #tpu.memory_space<vmem>>, vector<8x512xf32>,
    %c497_i32 = arith.constant 497 : i32
    %27 = tpu.dynamic_rotate %0 by %c497_i32 dim 1 : vector<8x512xf32>, i32 -> vector<8x512xf32>
    %c6 = arith.constant 6 : index
    %c0_14 = arith.constant 0 : index
    %28 = vector.load %arg3[%c6, %c0_14] : memref<9x512xf32, #tpu.memory_space<vmem>>, vector<1x512xf32>
    %29 = vector.broadcast %28 : vector<1x512xf32> to vector<8x512xf32>
    %30 = arith.mulf %27, %29 : vector<8x512xf32>
    %c48 = arith.constant 48 : index
    %c0_15 = arith.constant 0 : index
    %31 = vector.load %arg5[%c48, %c0_15] : memref<72x512xf32, #tpu.memory_space<vmem>>, vector<8x512xf32>
    tpu.vector_store %arg5[%c48, %c0_15], %30 {strides = array<i32>} : memref<72x512xf32, #tpu.memory_space<vmem>>, vector<8x512xf32>,
    %c496_i32 = arith.constant 496 : i32
    %32 = tpu.dynamic_rotate %0 by %c496_i32 dim 1 : vector<8x512xf32>, i32 -> vector<8x512xf32>
    %c7 = arith.constant 7 : index
    %c0_16 = arith.constant 0 : index
    %33 = vector.load %arg3[%c7, %c0_16] : memref<9x512xf32, #tpu.memory_space<vmem>>, vector<1x512xf32>
    %34 = vector.broadcast %33 : vector<1x512xf32> to vector<8x512xf32>
    %35 = arith.mulf %32, %34 : vector<8x512xf32>
    %c56 = arith.constant 56 : index
    %c0_17 = arith.constant 0 : index
    %36 = vector.load %arg5[%c56, %c0_17] : memref<72x512xf32, #tpu.memory_space<vmem>>, vector<8x512xf32>
    tpu.vector_store %arg5[%c56, %c0_17], %35 {strides = array<i32>} : memref<72x512xf32, #tpu.memory_space<vmem>>, vector<8x512xf32>,
    %c495_i32 = arith.constant 495 : i32
    %37 = tpu.dynamic_rotate %0 by %c495_i32 dim 1 : vector<8x512xf32>, i32 -> vector<8x512xf32>
    %c8_18 = arith.constant 8 : index
    %c0_19 = arith.constant 0 : index
    %38 = vector.load %arg3[%c8_18, %c0_19] : memref<9x512xf32, #tpu.memory_space<vmem>>, vector<1x512xf32>
    %39 = vector.broadcast %38 : vector<1x512xf32> to vector<8x512xf32>
    %40 = arith.mulf %37, %39 : vector<8x512xf32>
    %c64 = arith.constant 64 : index
    %c0_20 = arith.constant 0 : index
    %41 = vector.load %arg5[%c64, %c0_20] : memref<72x512xf32, #tpu.memory_space<vmem>>, vector<8x512xf32>
    tpu.vector_store %arg5[%c64, %c0_20], %40 {strides = array<i32>} : memref<72x512xf32, #tpu.memory_space<vmem>>, vector<8x512xf32>,
    %c0_21 = arith.constant 0 : index
    %c0_22 = arith.constant 0 : index
    %42 = vector.load %arg2[%c0_21, %c0_22] : memref<8x72xf32, #tpu.memory_space<vmem>>, vector<8x72xf32>
    %c0_23 = arith.constant 0 : index
    %c0_24 = arith.constant 0 : index
    %43 = vector.load %arg5[%c0_23, %c0_24] : memref<72x512xf32, #tpu.memory_space<vmem>>, vector<72x512xf32>
    %cst = arith.constant dense<0.000000e+00> : vector<8x512xf32>
    %44 = tpu.matmul %42, %43, %cst {dimension_numbers = #tpu.dot_dimension_numbers<[1], [0], [0], [1], [0, 0, 1, 1], [], []>} : vector<8x72xf32>, vector<72x512xf32>, vector<8x512xf32> -> vector<8x512xf32>
    %cst_25 = arith.constant 0.000000e+00 : f32
    %45 = vector.broadcast %cst_25 : f32 to vector<8x512xf32>
    %46 = arith.maximumf %44, %45 : vector<8x512xf32>
    %c0_26 = arith.constant 0 : index
    %c0_27 = arith.constant 0 : index
    %47 = vector.load %arg4[%c0_26, %c0_27] : memref<8x512xf32, #tpu.memory_space<vmem>>, vector<8x512xf32>
    tpu.vector_store %arg4[%c0_26, %c0_27], %46 {strides = array<i32>} : memref<8x512xf32, #tpu.memory_space<vmem>>, vector<8x512xf32>,
    return
  }
  func.func @transform_0(%arg0: i32) -> (i32, i32) {
    %c0_i32 = arith.constant 0 : i32
    %c0_i32_0 = arith.constant 0 : i32
    %c0_i32_1 = arith.constant 0 : i32
    return %c0_i32, %c0_i32_0 : i32, i32
  }
  func.func @transform_1(%arg0: i32) -> (i32, i32) {
    %c0_i32 = arith.constant 0 : i32
    %c0_i32_0 = arith.constant 0 : i32
    %c0_i32_1 = arith.constant 0 : i32
    return %c0_i32, %c0_i32_0 : i32, i32
  }
  func.func @transform_2(%arg0: i32) -> (i32, i32) {
    %c0_i32 = arith.constant 0 : i32
    %c0_i32_0 = arith.constant 0 : i32
    %c0_i32_1 = arith.constant 0 : i32
    return %c0_i32, %c0_i32_0 : i32, i32
  }
  func.func @transform_3(%arg0: i32) -> (i32, i32) {
    %c0_i32 = arith.constant 0 : i32
    %c0_i32_0 = arith.constant 0 : i32
    %c0_i32_1 = arith.constant 0 : i32
    return %c0_i32, %c0_i32_0 : i32, i32
  }
}

</mosaic_0001>

<bundles_post_ra>
// kernel: tpu_custom_call.1
= control target key start
LH: loop header
LB: loop body
LE: loop exit
PB: predicated region body
PF: predicated region fallthrough
CT: control target
= control target key end

     0   :  { %8 = vsyncpa [#allocation4], 0  ;;  %s896_s0 = inlined_call_operand.hbm [shape: f32[8,512], index: 0, kind: input, shape index: {}]   ;;  %s897_s1 = inlined_call_operand.hbm [shape: f32[8,72], index: 1, kind: input, shape index: {}]   ;;  %s898_s2 = inlined_call_operand.hbm [shape: f32[9,512], index: 2, kind: input, shape index: {}]   ;;  %s899_s3 = inlined_call_operand.hbm [shape: f32[8,512], index: 3, kind: output, shape index: {}]  }
   0x1   :  { %9 = vsyncpa [#allocation7], 0 }
   0x2   :  { %10 = vsyncpa [#allocation5], 0  ;;  %s723_s12 = smov [#allocation6]   ;;  %s724_s14 = smov [#allocation3]  }
   0x3   :  { %s27_s13 = sshll.u32 %s723_s12, 4  ;;  %s17_s15 = sshll.u32 %s724_s14, 4  ;;  %s28_s13 = int_to_ptr.vmem [resolvable:$true] %s27_s13  ;;  %s18_s15 = int_to_ptr.vmem [resolvable:$true] %s17_s15 }
   0x4   :  { %s645_s16 = scalar_lea.vmem %s28_s13, 128  ;;  %p650_p1 = scmp.lt.s32.totalorder %s28_s13, %s28_s13 }
   0x5   :  { %p646_p0 = scmp.ne.s32.totalorder %s28_s13, %s645_s16  ;;  %p651_p2 = scmp.lt.s32.totalorder %s645_s16, %s645_s16 }
   0x7   :  { %p652_p3 = por %p651_p2, %p650_p1 }
   0x9   :  { %p653_p4 = pnand %p652_p3, %p646_p0 }
   0xb   :  { %656 = shalt.err (!%p653_p4)
}
   0xc   :  { %30 = dma.hbm_to_vmem [thread:$0]  %s897_s1, 128, %s28_s13, [#allocation7]  }
   0xd   :  { %s665_s19 = scalar_lea.vmem %s18_s15, 512  ;;  %p670_p6 = scmp.lt.s32.totalorder %s18_s15, %s18_s15 }
   0xe   :  { %p666_p5 = scmp.ne.s32.totalorder %s18_s15, %s665_s19  ;;  %p671_p7 = scmp.lt.s32.totalorder %s665_s19, %s665_s19 }
  0x10   :  { %p672_p8 = por %p671_p7, %p670_p6 }
  0x12   :  { %p673_p9 = pnand %p672_p8, %p666_p5 }
  0x14   :  { %676 = shalt.err (!%p673_p9)
}
  0x15   :  { %20 = dma.hbm_to_vmem [thread:$0]  %s896_s0, 512, %s18_s15, [#allocation4]  }
  0x16   :  { %s725_s22 = smov [#allocation8]  }
  0x17   :  { %s36_s23 = sshll.u32 %s725_s22, 4  ;;  %s37_s23 = int_to_ptr.vmem [resolvable:$true] %s36_s23 }
  0x18   :  { %s685_s24 = scalar_lea.vmem %s37_s23, 1024  ;;  %p690_p11 = scmp.lt.s32.totalorder %s37_s23, %s37_s23 }
  0x19   :  { %p686_p10 = scmp.ne.s32.totalorder %s37_s23, %s685_s24  ;;  %p691_p12 = scmp.lt.s32.totalorder %s685_s24, %s685_s24 }
  0x1b   :  { %p692_p13 = por %p691_p12, %p690_p11 }
  0x1d   :  { %p693_p0 = pnand %p692_p13, %p686_p10 }
  0x1f   :  { %696 = shalt.err (!%p693_p0)
}
  0x20   :  { %s726_s1 = smov 512   ;;  %s727_s25 = smov 32  }
  0x21   :  { %42 = dma.hbm_to_vmem [thread:$0]  %s898_s2, 1024, %s37_s23, [#allocation7], %s726_s1, %s726_s1, %s727_s25  }
  0x22   :  { %717 = dma.done.wait [#allocation4], 512  }
  0x23   :  { %718 = vsyncadd [#allocation4], 4294966784 }
  0x24   :  { %719 = dma.done.wait [#allocation7], 1152  }
  0x25   :  { %720 = vsyncadd [#allocation7], 4294966144  ;;  %v767_v0 = vld [vmem:[#allocation3 + $0x10] sm:$0xff]  ;;  %v769_v1 = vld [vmem:[#allocation3] sm:$0xff]  ;;  %s728_s0 = smov 111   ;;  %s729_s2 = smov 112   ;;  %v64_v5 = vlaneseq }
  0x26   :  { %373 = vrot.lane.b32.xlu1 %v767_v0, %s728_s0  ;;  %369 = vrot.lane.b32.xlu0 %v769_v1, %s728_s0  ;;  %v773_v2 = vld [vmem:[#allocation3 + $0x18] sm:$0xff]  ;;  %v775_v3 = vld [vmem:[#allocation3 + $0x8] sm:$0xff]  ;;  %s730_s28 = smov 113   ;;  %s731_s29 = smov 127   ;;  %v735_v4 = vmov 0.0   ;;  %vm450_vm8 = vcmask 588800  }
  0x27   :  { %s732_s30 = smov 1   ;;  %s733_s4 = smov 15   ;;  %518 = vmatprep.mubr.f32.mxu0 %v735_v4  ;;  %589 = vmatprep.mubr.f32.mxu1 %v735_v4  ;;  %v74_v6 = vshrl.u32 %v64_v5, 7  ;;  %v807_v7 = vand.u32 127, %v64_v5 }
  0x28   :  { %s734_s5 = smov 16   ;;  %s736_s6 = smov 17   ;;  %v383_v12 = vld [vmem:[#allocation8 + $0x20] ss:$8 sm:$0xf] }
  0x29   :  { %v809_v8 = vsub.s32 1, %v74_v6  ;;  %v811_v9 = vsub.s32 3, %v74_v6  ;;  %v813_v10 = vsub.s32 0, %v74_v6  ;;  %v815_v11 = vsub.s32 2, %v74_v6  ;;  %s737_s7 = smov [#allocation9]  }
  0x2a   :  { %375 = vrot.lane.b32.xlu1 %v773_v2, %s728_s0  ;;  %371 = vrot.lane.b32.xlu0 %v775_v3, %s728_s0  ;;  %vm377_vm0 = vcmp.lt.s32.totalorder %v807_v7, 111  ;;  %v339_v30 = vld [vmem:[#allocation8 + $0x7] ss:$8 sm:$0xf]  ;;  %vm333_vm1 = vcmp.lt.s32.totalorder %v807_v7, 112  ;;  %vm289_vm2 = vcmp.lt.s32.totalorder %v807_v7, 113 }
  0x2b   :  { %v392_v15 = vrot.slane %v383_v12, %v809_v8  ;;  %v400_v16 = vrot.slane %v383_v12, %v811_v9  ;;  %v388_v17 = vrot.slane %v383_v12, %v813_v10  ;;  %v396_v18 = vrot.slane %v383_v12, %v815_v11  ;;  %v295_v47 = vld [vmem:[#allocation8 + $0x6] ss:$8 sm:$0xf]  ;;  %v251_v4 = vld [vmem:[#allocation8 + $0x5] ss:$8 sm:$0xf] }
  0x2c   :  { %v356_v32 = vrot.slane %v339_v30, %v811_v9  ;;  %v348_v33 = vrot.slane %v339_v30, %v809_v8  ;;  %v352_v34 = vrot.slane %v339_v30, %v815_v11  ;;  %v344_v35 = vrot.slane %v339_v30, %v813_v10  ;;  %s610_s8 = sshll.u32 %s737_s7, 4  ;;  %s611_s8 = int_to_ptr.vmem [resolvable:$true] %s610_s8 }
  0x2d   :  { %v312_v49 = vrot.slane %v295_v47, %v811_v9  ;;  %v304_v50 = vrot.slane %v295_v47, %v809_v8  ;;  %v308_v51 = vrot.slane %v295_v47, %v815_v11  ;;  %v300_v52 = vrot.slane %v295_v47, %v813_v10  ;;  %v115_v47 = vld [vmem:[#allocation8 + $0x1] ss:$8 sm:$0xf]  ;;  %s697_s9 = scalar_lea.vmem %s611_s8, 512  ;;  %p702_p2 = scmp.lt.s32.totalorder %s611_s8, %s611_s8 }
  0x2e   :  { %327 = vrot.lane.b32.xlu1 %v775_v3, %s729_s2  ;;  %325 = vrot.lane.b32.xlu0 %v769_v1, %s729_s2  ;;  %vm245_vm3 = vcmp.lt.s32.totalorder %v807_v7, 127  ;;  %v268_v6 = vrot.slane %v251_v4, %v811_v9  ;;  %v260_v12 = vrot.slane %v251_v4, %v809_v8  ;;  %vm197_vm4 = vcmp.lt.s32.totalorder %v807_v7, 1  ;;  %p698_p1 = scmp.ne.s32.totalorder %s611_s8, %s697_s9  ;;  %p703_p3 = scmp.lt.s32.totalorder %s697_s9, %s697_s9 }
  0x2f   :  { %vm153_vm5 = vcmp.lt.s32.totalorder %v807_v7, 15  ;;  %vm109_vm6 = vcmp.lt.s32.totalorder %v807_v7, 16  ;;  %vm66_vm7 = vcmp.lt.s32.totalorder %v807_v7, 17 }
  0x30   :  { %p704_p4 = por %p703_p3, %p702_p2 }
  0x32   :  { %331 = vrot.lane.b32.xlu1 %v773_v2, %s729_s2  ;;  %329 = vrot.lane.b32.xlu0 %v767_v0, %s729_s2  ;;  %p705_p5 = pnand %p704_p4, %p698_p1 }
  0x36   :  { %283 = vrot.lane.b32.xlu1 %v775_v3, %s730_s28  ;;  %281 = vrot.lane.b32.xlu0 %v769_v1, %s730_s28 }
  0x3a   :  { %287 = vrot.lane.b32.xlu1 %v773_v2, %s730_s28  ;;  %285 = vrot.lane.b32.xlu0 %v767_v0, %s730_s28 }
  0x3e   :  { %239 = vrot.lane.b32.xlu1 %v775_v3, %s731_s29  ;;  %237 = vrot.lane.b32.xlu0 %v769_v1, %s731_s29 }
  0x42   :  { %243 = vrot.lane.b32.xlu1 %v773_v2, %s731_s29  ;;  %241 = vrot.lane.b32.xlu0 %v767_v0, %s731_s29 }
  0x46   :  { %191 = vrot.lane.b32.xlu1 %v775_v3, %s732_s30  ;;  %189 = vrot.lane.b32.xlu0 %v769_v1, %s732_s30 }
  0x4a   :  { %195 = vrot.lane.b32.xlu1 %v773_v2, %s732_s30  ;;  %193 = vrot.lane.b32.xlu0 %v767_v0, %s732_s30 }
  0x4e   :  { %147 = vrot.lane.b32.xlu1 %v775_v3, %s733_s4  ;;  %145 = vrot.lane.b32.xlu0 %v769_v1, %s733_s4 }
  0x52   :  { %151 = vrot.lane.b32.xlu1 %v773_v2, %s733_s4  ;;  %149 = vrot.lane.b32.xlu0 %v767_v0, %s733_s4 }
  0x56   :  { %103 = vrot.lane.b32.xlu1 %v775_v3, %s734_s5  ;;  %101 = vrot.lane.b32.xlu0 %v769_v1, %s734_s5 }
  0x5a   :  { %107 = vrot.lane.b32.xlu1 %v773_v2, %s734_s5  ;;  %105 = vrot.lane.b32.xlu0 %v767_v0, %s734_s5 }
  0x5e   :  { %58 = vrot.lane.b32.xlu1 %v775_v3, %s736_s6  ;;  %56 = vrot.lane.b32.xlu0 %v769_v1, %s736_s6 }
  0x62   :  { %62 = vrot.lane.b32.xlu1 %v773_v2, %s736_s6  ;;  %60 = vrot.lane.b32.xlu0 %v767_v0, %s736_s6 }
  0x98   :  { %v374_v13 = vpop.permute.xlu1 %373  ;;  %v370_v14 = vpop.permute.xlu0 %369 }
  0x9c   :  { %v376_v19 = vpop.permute.xlu1 %375  ;;  %v372_v20 = vpop.permute.xlu0 %371 }
  0x9d   :  { %v378_v21 = vsel %vm377_vm0, %v374_v13, %v376_v19  ;;  %v380_v22 = vsel %vm377_vm0, %v370_v14, %v372_v20  ;;  %v379_v23 = vsel %vm377_vm0, %v372_v20, %v374_v13  ;;  %v381_v24 = vsel %vm377_vm0, %v376_v19, %v370_v14 }
  0x9e   :  { %v406_v25 = vmul.f32 %v392_v15, %v379_v23  ;;  %v408_v26 = vmul.f32 %v400_v16, %v381_v24  ;;  %v405_v27 = vmul.f32 %v388_v17, %v380_v22  ;;  %v407_v28 = vmul.f32 %v396_v18, %v378_v21  ;;  %v203_v15 = vld [vmem:[#allocation8 + $0x3] ss:$8 sm:$0xf] }
  0x9f   :  { %v264_v13 = vrot.slane %v251_v4, %v815_v11  ;;  %v256_v14 = vrot.slane %v251_v4, %v813_v10  ;;  %v208_v30 = vrot.slane %v203_v15, %v813_v10  ;;  %v71_v4 = vld [vmem:[#allocation8] ss:$8 sm:$0xf] }
  0xa0   :  { %v328_v29 = vpop.permute.xlu1 %327  ;;  %468 = vmatprep.subr.mxu0 %v406_v25  ;;  %539 = vmatprep.subr.mxu1 %v408_v26  ;;  %v326_v31 = vpop.permute.xlu0 %325  ;;  %v212_v25 = vrot.slane %v203_v15, %v809_v8 }
  0xa1   :  { %469 = vmatpush1.msra.mxu0 %v405_v27  ;;  %540 = vmatpush1.msra.mxu1 %v407_v28  ;;  %v336_v36 = vsel %vm333_vm1, %v326_v31, %v328_v29 }
  0xa2   :  { %v361_v45 = vmul.f32 %v344_v35, %v336_v36 }
  0xa4   :  { %v332_v37 = vpop.permute.xlu1 %331  ;;  %v330_v38 = vpop.permute.xlu0 %329 }
  0xa5   :  { %v337_v39 = vsel %vm333_vm1, %v332_v37, %v326_v31  ;;  %v334_v40 = vsel %vm333_vm1, %v330_v38, %v332_v37  ;;  %v335_v41 = vsel %vm333_vm1, %v328_v29, %v330_v38 }
  0xa6   :  { %v364_v42 = vmul.f32 %v356_v32, %v337_v39  ;;  %v362_v43 = vmul.f32 %v348_v33, %v335_v41  ;;  %v363_v44 = vmul.f32 %v352_v34, %v334_v40  ;;  %v216_v32 = vrot.slane %v203_v15, %v815_v11  ;;  %v159_v34 = vld [vmem:[#allocation8 + $0x2] ss:$8 sm:$0xf] }
  0xa7   :  { %v220_v33 = vrot.slane %v203_v15, %v811_v9 }
  0xa8   :  { %v284_v46 = vpop.permute.xlu1 %283  ;;  %470 = vmatprep.subr.mxu0 %v362_v43  ;;  %541 = vmatprep.subr.mxu1 %v364_v42  ;;  %v282_v48 = vpop.permute.xlu0 %281 }
  0xa9   :  { %471 = vmatpush1.msra.mxu0 %v361_v45  ;;  %542 = vmatpush1.msra.mxu1 %v363_v44  ;;  %v292_v53 = vsel %vm289_vm2, %v282_v48, %v284_v46  ;;  %v164_v44 = vrot.slane %v159_v34, %v813_v10  ;;  %v172_v45 = vrot.slane %v159_v34, %v815_v11 }
  0xaa   :  { %v317_v62 = vmul.f32 %v300_v52, %v292_v53 }
  0xac   :  { %v288_v54 = vpop.permute.xlu1 %287  ;;  %v286_v55 = vpop.permute.xlu0 %285 }
  0xad   :  { %v293_v56 = vsel %vm289_vm2, %v288_v54, %v282_v48  ;;  %v290_v57 = vsel %vm289_vm2, %v286_v55, %v288_v54  ;;  %v291_v58 = vsel %vm289_vm2, %v284_v46, %v286_v55  ;;  %v176_v46 = vrot.slane %v159_v34, %v811_v9 }
  0xae   :  { %v320_v59 = vmul.f32 %v312_v49, %v293_v56  ;;  %v318_v60 = vmul.f32 %v304_v50, %v291_v58  ;;  %v319_v61 = vmul.f32 %v308_v51, %v290_v57  ;;  %v124_v56 = vrot.slane %v115_v47, %v809_v8 }
  0xb0   :  { %v240_v63 = vpop.permute.xlu1 %239  ;;  %472 = vmatprep.subr.mxu0 %v318_v60  ;;  %543 = vmatprep.subr.mxu1 %v320_v59  ;;  %v238_v5 = vpop.permute.xlu0 %237 }
  0xb1   :  { %473 = vmatpush1.msra.mxu0 %v317_v62  ;;  %544 = vmatpush1.msra.mxu1 %v319_v61  ;;  %v248_v16 = vsel %vm245_vm3, %v238_v5, %v240_v63  ;;  %v120_v61 = vrot.slane %v115_v47, %v813_v10  ;;  %v128_v62 = vrot.slane %v115_v47, %v815_v11 }
  0xb2   :  { %v273_v26 = vmul.f32 %v256_v14, %v248_v16 }
  0xb4   :  { %v244_v17 = vpop.permute.xlu1 %243  ;;  %v242_v18 = vpop.permute.xlu0 %241 }
  0xb5   :  { %v249_v19 = vsel %vm245_vm3, %v244_v17, %v238_v5  ;;  %v246_v20 = vsel %vm245_vm3, %v242_v18, %v244_v17  ;;  %v247_v21 = vsel %vm245_vm3, %v240_v63, %v242_v18  ;;  %v132_v63 = vrot.slane %v115_v47, %v811_v9 }
  0xb6   :  { %v276_v22 = vmul.f32 %v268_v6, %v249_v19  ;;  %v274_v23 = vmul.f32 %v260_v12, %v247_v21  ;;  %v275_v24 = vmul.f32 %v264_v13, %v246_v20  ;;  %v80_v18 = vrot.slane %v71_v4, %v809_v8 }
  0xb8   :  { %v192_v27 = vpop.permute.xlu1 %191  ;;  %474 = vmatprep.subr.mxu0 %v274_v23  ;;  %545 = vmatprep.subr.mxu1 %v276_v22  ;;  %v190_v28 = vpop.permute.xlu0 %189  ;;  %v76_v23 = vrot.slane %v71_v4, %v813_v10  ;;  %v413_v10 = vld [vmem:[#allocation6] sm:$0xff] }
  0xb9   :  { %v200_v29 = vsel %vm197_vm4, %v190_v28, %v192_v27  ;;  %475 = vmatpush1.msra.mxu0 %v273_v26  ;;  %546 = vmatpush1.msra.mxu1 %v275_v24  ;;  %v84_v24 = vrot.slane %v71_v4, %v815_v11 }
  0xba   :  { %v226_v31 = vmul.f32 %v212_v25, %v200_v29  ;;  %476 = vmatprep.subr.mxu0 %v775_v3  ;;  %547 = vmatprep.subr.mxu1 %v773_v2  ;;  %v88_v25 = vrot.slane %v71_v4, %v811_v9 }
  0xbb   :  { %477 = vmatpush1.msra.mxu0 %v769_v1  ;;  %548 = vmatpush1.msra.mxu1 %v767_v0  ;;  %v168_v0 = vrot.slane %v159_v34, %v809_v8 }
  0xbc   :  { %v196_v35 = vpop.permute.xlu1 %195  ;;  %478 = vmatprep.subr.mxu0 %v226_v31  ;;  %v194_v36 = vpop.permute.xlu0 %193 }
  0xbd   :  { %v201_v37 = vsel %vm197_vm4, %v196_v35, %v190_v28  ;;  %v198_v3 = vsel %vm197_vm4, %v194_v36, %v196_v35  ;;  %v199_v38 = vsel %vm197_vm4, %v192_v27, %v194_v36 }
  0xbe   :  { %v225_v2 = vmul.f32 %v208_v30, %v201_v37  ;;  %v227_v39 = vmul.f32 %v216_v32, %v199_v38  ;;  %v228_v1 = vmul.f32 %v220_v33, %v198_v3 }
  0xc0   :  { %v148_v40 = vpop.permute.xlu1 %147  ;;  %479 = vmatpush1.msra.mxu0 %v225_v2  ;;  %549 = vmatprep.subr.mxu1 %v228_v1  ;;  %v146_v41 = vpop.permute.xlu0 %145 }
  0xc1   :  { %v156_v42 = vsel %vm153_vm5, %v146_v41, %v148_v40  ;;  %550 = vmatpush1.msra.mxu1 %v227_v39 }
  0xc2   :  { %v182_v43 = vmul.f32 %v168_v0, %v156_v42 }
  0xc4   :  { %v152_v48 = vpop.permute.xlu1 %151  ;;  %480 = vmatprep.subr.mxu0 %v182_v43  ;;  %v150_v49 = vpop.permute.xlu0 %149 }
  0xc5   :  { %v157_v50 = vsel %vm153_vm5, %v152_v48, %v146_v41  ;;  %v154_v51 = vsel %vm153_vm5, %v150_v49, %v152_v48  ;;  %v155_v52 = vsel %vm153_vm5, %v148_v40, %v150_v49 }
  0xc6   :  { %v181_v53 = vmul.f32 %v164_v44, %v157_v50  ;;  %v183_v54 = vmul.f32 %v172_v45, %v155_v52  ;;  %v184_v55 = vmul.f32 %v176_v46, %v154_v51 }
  0xc8   :  { %v104_v57 = vpop.permute.xlu1 %103  ;;  %481 = vmatpush1.msra.mxu0 %v181_v53  ;;  %551 = vmatprep.subr.mxu1 %v184_v55  ;;  %v102_v58 = vpop.permute.xlu0 %101 }
  0xc9   :  { %v112_v59 = vsel %vm109_vm6, %v102_v58, %v104_v57  ;;  %552 = vmatpush1.msra.mxu1 %v183_v54 }
  0xca   :  { %v138_v60 = vmul.f32 %v124_v56, %v112_v59 }
  0xcc   :  { %v108_v5 = vpop.permute.xlu1 %107  ;;  %482 = vmatprep.subr.mxu0 %v138_v60  ;;  %v106_v6 = vpop.permute.xlu0 %105 }
  0xcd   :  { %v113_v12 = vsel %vm109_vm6, %v108_v5, %v102_v58  ;;  %v110_v13 = vsel %vm109_vm6, %v106_v6, %v108_v5  ;;  %v111_v14 = vsel %vm109_vm6, %v104_v57, %v106_v6 }
  0xce   :  { %v137_v15 = vmul.f32 %v120_v61, %v113_v12  ;;  %v139_v16 = vmul.f32 %v128_v62, %v111_v14  ;;  %v140_v17 = vmul.f32 %v132_v63, %v110_v13 }
  0xd0   :  { %v59_v19 = vpop.permute.xlu1 %58  ;;  %483 = vmatpush1.msra.mxu0 %v137_v15  ;;  %553 = vmatprep.subr.mxu1 %v140_v17  ;;  %v57_v20 = vpop.permute.xlu0 %56 }
  0xd1   :  { %v69_v21 = vsel %vm66_vm7, %v57_v20, %v59_v19  ;;  %554 = vmatpush1.msra.mxu1 %v139_v16 }
  0xd2   :  { %v94_v22 = vmul.f32 %v80_v18, %v69_v21 }
  0xd4   :  { %v63_v26 = vpop.permute.xlu1 %62  ;;  %484 = vmatprep.subr.mxu0 %v94_v22  ;;  %v61_v27 = vpop.permute.xlu0 %60 }
  0xd5   :  { %v70_v8 = vsel %vm66_vm7, %v63_v26, %v57_v20  ;;  %v67_v28 = vsel %vm66_vm7, %v61_v27, %v63_v26  ;;  %v68_v29 = vsel %vm66_vm7, %v59_v19, %v61_v27 }
  0xd6   :  { %v93_v30 = vmul.f32 %v76_v23, %v70_v8  ;;  %v95_v31 = vmul.f32 %v84_v24, %v68_v29  ;;  %v96_v32 = vmul.f32 %v88_v25, %v67_v28 }
  0xd8   :  { %485 = vmatpush1.msra.mxu0 %v93_v30  ;;  %555 = vmatprep.subr.mxu1 %v96_v32 }
  0xd9   :  { %620 = vmatmul.mubr.msk.f32.vlgmr.msra.gmra.mxu0 %vm450_vm8, %v413_v10  ;;  %556 = vmatpush1.msra.mxu1 %v95_v31 }
  0xda   :  { %621 = vmatmul.mubr.msk.f32.vlgmr.msra.gmra.mxu1 %vm450_vm8, %v413_v10 }
 0x199   :  { %v520_v9 = vpop.f32.mrf.mxu0 }
 0x19a   :  { %v596_v11 = vmax.f32 %v520_v9, 0.0  ;;  %v591_v33 = vpop.f32.mrf.mxu1 }
 0x19b   :  { %v598_v34 = vmax.f32 %v591_v33, 0.0  ;;  %v522_v35 = vpop.f32.mrf.mxu0 }
 0x19c   :  { %600 = vst [vmem:[#allocation9] sm:$0xff] %v596_v11  ;;  %v597_v7 = vmax.f32 %v522_v35, 0.0  ;;  %v593_v36 = vpop.f32.mrf.mxu1 }
 0x19d   :  { %602 = vst [vmem:[#allocation9 + $0x10] sm:$0xff] %v598_v34  ;;  %v599_v37 = vmax.f32 %v593_v36, 0.0 }
 0x19e   :  { %601 = vst [vmem:[#allocation9 + $0x8] sm:$0xff] %v597_v7 }
 0x19f   :  { %603 = vst [vmem:[#allocation9 + $0x18] sm:$0xff] %v599_v37 }
 0x1a0   :  { %708 = shalt.err (!%p705_p5)
}
 0x1a1   :  { %613 = dma.vmem_to_hbm [thread:$0]  %s611_s8, 512, %s899_s3, [#allocation5]  }
 0x1a2   :  { %721 = dma.done.wait [#allocation5], 512  }
 0x1a3   :  { %722 = vsyncadd [#allocation5], 4294966784 }
 0x1a4   :  { %617 = vsyncpa [#allocation4], 1 }
 0x1a5   :  { %618 = vsyncpa [#allocation7], 1 }
 0x1a6   :  { %619 = vsyncpa [#allocation5], 1 }

</bundles_post_ra>
